<compile_context>
chip_gen: v6e
topology: v6e:2x2x1
jax: 0.10.0
libtpu: 0.0.40
codegen_flags: <defaults>
</compile_context>

<pallas_src>
import functools

import jax
import jax.numpy as jnp
from jax.experimental import pallas as pl
from jax.experimental.pallas import tpu as pltpu

THRESHOLD = 0.256
MAX_VAL = 1.0          # float images: bound is 1.0
APPLY_PROB = 0.5       # torchvision RandomSolarize default p

_LANE = 1024           # lane-dense last dim (8 * 128)
_TILE_ROWS = 512       # ~2 MiB f32 per block -> ~85% of HBM roofline


def _solarize_kernel(apply_ref, x_ref, o_ref, *, threshold, max_val):
    # apply_ref: SMEM int32[1] scalar-prefetch flag (1 = solarize, 0 = identity)
    x = x_ref[...]
    thr = jnp.asarray(threshold, x.dtype)
    mx = jnp.asarray(max_val, x.dtype)
    do_apply = apply_ref[0] != 0

    @pl.when(do_apply)
    def _():
        # single vselect per element; no f32 mask intermediate, no vmul
        o_ref[...] = jnp.where(x >= thr, mx - x, x)

    @pl.when(jnp.logical_not(do_apply))
    def _():
        o_ref[...] = x


def solarize(x, key, threshold=THRESHOLD, p=APPLY_PROB, max_val=MAX_VAL):
    """RandomSolarize forward for a float image tensor of any shape."""
    orig_shape = x.shape
    orig_dtype = x.dtype
    total = x.size

    # --- flatten to a lane-dense 2-D slab -------------------------------
    flat = x.reshape(-1)
    lane_pad = (-total) % _LANE
    if lane_pad:
        flat = jnp.concatenate([flat, jnp.zeros((lane_pad,), dtype=orig_dtype)])
    rows = flat.size // _LANE
    x2d = flat.reshape(rows, _LANE)

    # --- row tiling ------------------------------------------------------
    if rows <= _TILE_ROWS:
        block_rows = rows            # block == full dim -> (8,128) rule satisfied
    else:
        row_pad = (-rows) % _TILE_ROWS
        if row_pad:
            x2d = jnp.concatenate(
                [x2d, jnp.zeros((row_pad, _LANE), dtype=orig_dtype)], axis=0)
            rows += row_pad
        block_rows = _TILE_ROWS
    grid_rows = rows // block_rows

    # --- random "apply" draw (host-side JAX RNG, prefetched as scalar) ---
    apply_flag = jax.random.bernoulli(key, p).astype(jnp.int32).reshape((1,))

    kernel = functools.partial(_solarize_kernel,
                               threshold=threshold, max_val=max_val)

    out2d = pl.pallas_call(
        kernel,
        out_shape=jax.ShapeDtypeStruct((rows, _LANE), orig_dtype),
        grid_spec=pltpu.PrefetchScalarGridSpec(
            num_scalar_prefetch=1,
            grid=(grid_rows,),
            in_specs=[pl.BlockSpec((block_rows, _LANE),
                                   lambda i, apply: (i, 0))],
            out_specs=pl.BlockSpec((block_rows, _LANE),
                                   lambda i, apply: (i, 0)),
        ),
        compiler_params=pltpu.CompilerParams(
            dimension_semantics=("parallel",),
            vmem_limit_bytes=32 * 1024 * 1024,  # safe on v5e/v6e/v7x
        ),
    )(apply_flag, x2d)

    return out2d.reshape(-1)[:total].reshape(orig_shape)


def solarize_reference(x, apply_flag, threshold=THRESHOLD, max_val=MAX_VAL):
    """Pure-JAX reference for correctness checking."""
    sol = jnp.where(x >= threshold, max_val - x, x).astype(x.dtype)
    return jnp.where(apply_flag != 0, sol, x).astype(x.dtype)


if __name__ == "__main__":
    key = jax.random.PRNGKey(0)
    k_img, k_rand = jax.random.split(key)

    B, C, H, W = 2, 4, 16, 16
    img = jax.random.uniform(k_img, (B, C, H, W), dtype=jnp.float32)

    out = solarize(img, k_rand)
    out = jax.block_until_ready(out)

    # recompute the same Bernoulli draw used inside solarize()
    apply_flag = jax.random.bernoulli(k_rand, APPLY_PROB).astype(jnp.int32)
    ref = solarize_reference(img, apply_flag)

    assert out.shape == img.shape and out.dtype == img.dtype
    assert jnp.allclose(out, ref, atol=1e-6), "Pallas solarize mismatch vs reference"

    # TODO(synk): the RandomSolarize "p" gate is drawn with jax.random outside
    # the kernel (one Bernoulli per call); per-sample gating within a batch
    # would need a per-image flag vector instead of a single scalar.
    print("KERNEL_OK")
</pallas_src>

<mosaic_0001>
module attributes {stable_mosaic.version = 11 : i64} {
  func.func @_solarize_kernel(%arg0: i32, %arg1: memref<1xi32, #tpu.memory_space<smem>>, %arg2: memref<2x1024xf32, #tpu.memory_space<vmem>>, %arg3: memref<2x1024xf32, #tpu.memory_space<vmem>>) attributes {dimension_semantics = [#tpu.dimension_semantics<parallel>], iteration_bounds = array<i64: 1>, scalar_prefetch = 1 : i64, scratch_operands = 0 : i64, tpu.core_type = #tpu.core_type<tc>, window_params = [{transform_indices = @transform_0, window_bounds = array<i64: 2, 1024>}, {transform_indices = @transform_1, window_bounds = array<i64: 2, 1024>}]} {
    %c0 = arith.constant 0 : index
    %c0_0 = arith.constant 0 : index
    %0 = vector.load %arg2[%c0, %c0_0] : memref<2x1024xf32, #tpu.memory_space<vmem>>, vector<2x1024xf32>
    %c0_1 = arith.constant 0 : index
    %1 = memref.load %arg1[%c0_1] : memref<1xi32, #tpu.memory_space<smem>>
    %c0_i32 = arith.constant 0 : i32
    %2 = arith.cmpi ne, %1, %c0_i32 : i32
    %3 = arith.extui %2 : i1 to i32
    %cst = arith.constant 2.560000e-01 : f32
    %cst_2 = arith.constant 1.000000e+00 : f32
    %c0_i32_3 = arith.constant 0 : i32
    %4 = arith.cmpi ne, %3, %c0_i32_3 : i32
    scf.if %4 {
      %8 = vector.broadcast %cst : f32 to vector<2x1024xf32>
      %9 = arith.cmpf oge, %0, %8 : vector<2x1024xf32>
      %10 = vector.broadcast %cst_2 : f32 to vector<2x1024xf32>
      %11 = arith.subf %10, %0 : vector<2x1024xf32>
      %12 = arith.select %9, %11, %0 : vector<2x1024xi1>, vector<2x1024xf32>
      %c0_5 = arith.constant 0 : index
      %c0_6 = arith.constant 0 : index
      %13 = vector.load %arg3[%c0_5, %c0_6] : memref<2x1024xf32, #tpu.memory_space<vmem>>, vector<2x1024xf32>
      tpu.vector_store %arg3[%c0_5, %c0_6], %12 {strides = array<i32>} : memref<2x1024xf32, #tpu.memory_space<vmem>>, vector<2x1024xf32>,
    } else {
    }
    %true = arith.constant true
    %5 = arith.xori %2, %true : i1
    %6 = arith.extui %5 : i1 to i32
    %c0_i32_4 = arith.constant 0 : i32
    %7 = arith.cmpi ne, %6, %c0_i32_4 : i32
    scf.if %7 {
      %c0_5 = arith.constant 0 : index
      %c0_6 = arith.constant 0 : index
      %8 = vector.load %arg3[%c0_5, %c0_6] : memref<2x1024xf32, #tpu.memory_space<vmem>>, vector<2x1024xf32>
      tpu.vector_store %arg3[%c0_5, %c0_6], %0 {strides = array<i32>} : memref<2x1024xf32, #tpu.memory_space<vmem>>, vector<2x1024xf32>,
    } else {
    }
    return
  }
  func.func @transform_0(%arg0: i32, %arg1: memref<1xi32, #tpu.memory_space<smem>>) -> (i32, i32) {
    %c0_i32 = arith.constant 0 : i32
    %c0_i32_0 = arith.constant 0 : i32
    return %arg0, %c0_i32 : i32, i32
  }
  func.func @transform_1(%arg0: i32, %arg1: memref<1xi32, #tpu.memory_space<smem>>) -> (i32, i32) {
    %c0_i32 = arith.constant 0 : i32
    %c0_i32_0 = arith.constant 0 : i32
    return %arg0, %c0_i32 : i32, i32
  }
}

</mosaic_0001>

<bundles_post_ra>
// kernel: tpu_custom_call.1
= control target key start
LH: loop header
LB: loop body
LE: loop exit
PB: predicated region body
PF: predicated region fallthrough
CT: control target
= control target key end

     0   :  { %8 = vsyncpa [#allocation5], 0  ;;  %s136_s0 = inlined_call_operand.<no memory space> [shape: s32[1], index: 0, kind: input, shape index: {}]   ;;  %s137_s1 = inlined_call_operand.hbm [shape: f32[2,1024], index: 1, kind: input, shape index: {}]   ;;  %s138_s2 = inlined_call_operand.hbm [shape: f32[2,1024], index: 2, kind: output, shape index: {}]  }
   0x1   :  { %9 = vsyncpa [#allocation6], 0  ;;  %s107_s9 = smov [#allocation4]  }
   0x2   :  { %s16_s10 = sshll.u32 %s107_s9, 4  ;;  %s17_s10 = int_to_ptr.vmem [resolvable:$true] %s16_s10 }
   0x3   :  { %s71_s11 = scalar_lea.vmem %s17_s10, 256  ;;  %p76_p1 = scmp.lt.s32.totalorder %s17_s10, %s17_s10 }
   0x4   :  { %p72_p0 = scmp.ne.s32.totalorder %s17_s10, %s71_s11  ;;  %p77_p2 = scmp.lt.s32.totalorder %s71_s11, %s71_s11 }
   0x6   :  { %p78_p3 = por %p77_p2, %p76_p1 }
   0x8   :  { %p79_p4 = pnand %p78_p3, %p72_p0 }
   0xa   :  { %82 = shalt.err (!%p79_p4)
}
   0xb   :  { %19 = dma.hbm_to_vmem [thread:$0]  %s137_s1, 256, %s17_s10, [#allocation5]  }
   0xc   :  { %103 = dma.done.wait [#allocation5], 256  }
   0xd   :  { %104 = vsyncadd [#allocation5], 4294967040  ;;  %v23_v0 = vld [vmem:[#allocation4] sm:$0xff]  ;;  %v24_v1 = vld [vmem:[#allocation4 + $0x8] sm:$0xff]  ;;  %p59_p5 = scmp.eq.s32.totalorder %s136_s0, 0 }
   0xf   :  { %29 = sbr.rel (%p59_p5) target bundleno = 24 (0x18), region = 13 }
  0x14   :  { %vm30_vm0 = vcmp.ge.f32.partialorder %v23_v0, 0.256  ;;  %v32_v2 = vsub.f32 1.0, %v23_v0  ;;  %vm31_vm1 = vcmp.ge.f32.partialorder %v24_v1, 0.256  ;;  %v33_v3 = vsub.f32 1.0, %v24_v1 }
  0x16   :  { %v34_v4 = vsel %vm30_vm0, %v32_v2, %v23_v0  ;;  %v35_v5 = vsel %vm31_vm1, %v33_v3, %v24_v1 }
  0x17   :  { %36 = vst [vmem:[#allocation7] sm:$0xff] %v34_v4  ;;  %37 = vst [vmem:[#allocation7 + $0x8] sm:$0xff] %v35_v5 }
  0x18 PF:  { %p60_p6 = scmp.ne.s32.totalorder %s136_s0, 0 }
  0x1a   :  { %41 = sbr.rel (%p60_p6) target bundleno = 32 (0x20), region = 17 }
  0x1f   :  { %42 = vst [vmem:[#allocation7] sm:$0xff] %v23_v0  ;;  %43 = vst [vmem:[#allocation7 + $0x8] sm:$0xff] %v24_v1 }
  0x20 PF:  { %s108_s17 = smov [#allocation7]  }
  0x21   :  { %s50_s18 = sshll.u32 %s108_s17, 4  ;;  %s51_s18 = int_to_ptr.vmem [resolvable:$true] %s50_s18 }
  0x22   :  { %s83_s19 = scalar_lea.vmem %s51_s18, 256  ;;  %p88_p8 = scmp.lt.s32.totalorder %s51_s18, %s51_s18 }
  0x23   :  { %p84_p7 = scmp.ne.s32.totalorder %s51_s18, %s83_s19  ;;  %p89_p9 = scmp.lt.s32.totalorder %s83_s19, %s83_s19 }
  0x25   :  { %p90_p10 = por %p89_p9, %p88_p8 }
  0x27   :  { %p91_p11 = pnand %p90_p10, %p84_p7 }
  0x29   :  { %94 = shalt.err (!%p91_p11)
}
  0x2a   :  { %53 = dma.vmem_to_hbm [thread:$0]  %s51_s18, 256, %s138_s2, [#allocation6]  }
  0x2b   :  { %105 = dma.done.wait [#allocation6], 256  }
  0x2c   :  { %106 = vsyncadd [#allocation6], 4294967040 }
  0x2d   :  { %57 = vsyncpa [#allocation5], 1 }
  0x2e   :  { %58 = vsyncpa [#allocation6], 1 }

</bundles_post_ra>
